<compile_context>
chip_gen: v7x
topology: tpu7x:2x2x1
jax: 0.10.0
libtpu: 0.0.40
codegen_flags: <defaults>
</compile_context>

<pallas_src>
import functools

import jax
import jax.numpy as jnp
from jax.experimental import pallas as pl
from jax.experimental.pallas import tpu as pltpu


# ----------------------------- hardware queries ------------------------------

def _vmem_capacity_bytes():
    """Physical VMEM per core, with a conservative fallback."""
    try:
        cap = int(getattr(pltpu.get_tpu_info(), "vmem_capacity_bytes"))
        if cap > 0:
            return cap
    except Exception:
        pass
    try:
        kind = jax.devices()[0].device_kind.lower()
    except Exception:
        kind = ""
    if "v7" in kind:
        return 64 * 1024 * 1024
    return 128 * 1024 * 1024


def _num_tensorcores():
    """TensorCores that share the 'parallel' grid axes (megacore); default 1."""
    try:
        info = pltpu.get_tpu_info()
        for attr in ("num_cores", "core_count", "num_tensorcores",
                     "tensorcores_per_chip"):
            v = getattr(info, attr, None)
            if v:
                return int(v)
    except Exception:
        pass
    try:
        d = jax.devices()[0]
        for attr in ("num_cores", "core_count"):
            v = getattr(d, attr, None)
            if v:
                return int(v)
    except Exception:
        pass
    return 1


def _round_up(v, m):
    return ((v + m - 1) // m) * m


def _round_down(v, m):
    return max(m, (v // m) * m)


# --------------------------------- kernel ------------------------------------

def _sae_kernel(x_ref, wenc_t_ref, benc_ref, wdec_t_ref, bdec_ref,
                out_ref, hid_ref, acc_ref):
    """Fused SAE forward for one (row-block, hidden-tile) grid point.

    x_ref:      (bm, n_embd)       activation rows (constant over h-axis)
    wenc_t_ref: (n_embd, bh)       enc.weight.T column tile (bf16)
    benc_ref:   (1, bh)            folded encoder bias tile (f32)
    wdec_t_ref: (bh, n_embd)       dec.weight.T row tile (bf16)
    bdec_ref:   (1, n_embd)        dec.bias
    out_ref:    (bm, n_embd)       decoder output (resident over h-axis)
    hid_ref:    (bm, bh)           hidden activation tile
    acc_ref:    (bm, n_embd) f32   decoder accumulator scratch
    """
    j = pl.program_id(1)
    nh = pl.num_programs(1)

    # Encoder for this hidden tile: relu(x @ Wenc_t[:, tile] + b_enc_eff[tile]).
    # Cast x to the weight dtype so the MXU takes the fast bf16 path.
    x = x_ref[...].astype(wenc_t_ref.dtype)
    pre = jnp.dot(x, wenc_t_ref[...],
                  preferred_element_type=jnp.float32) + benc_ref[...]
    hidden = jnp.maximum(pre, 0.0)
    hid_ref[...] = hidden.astype(hid_ref.dtype)

    @pl.when(j == 0)
    def _():
        acc_ref[...] = jnp.zeros_like(acc_ref)

    # Decoder partial product for this tile (bf16 weights -> bf16 MXU path).
    acc_ref[...] += jnp.dot(hidden.astype(wdec_t_ref.dtype), wdec_t_ref[...],
                            preferred_element_type=jnp.float32)

    @pl.when(j == nh - 1)
    def _():
        out_ref[...] = (acc_ref[...]
                        + bdec_ref[...].astype(jnp.float32)).astype(out_ref.dtype)


# ------------------------------- host wrappers --------------------------------

def prepare_sae_params(w_enc, b_enc, w_dec, b_dec, weight_dtype=jnp.bfloat16):
    """One-time (outside the hot path) conversion from PyTorch nn.Linear layout.

    w_enc: (h_dim, n_embd), b_enc: (h_dim,), w_dec: (n_embd, h_dim), b_dec: (n_embd,)
    Returns (w_enc_t, b_enc_eff, w_dec_t, b_dec):
      * weights pre-transposed and cast to `weight_dtype` (bf16 by default),
      * dec.bias folded into the encoder bias:
        relu((x - b_dec) @ Wenc^T + b_enc) == relu(x @ Wenc^T + (b_enc - b_dec @ Wenc^T))
    """
    w_enc_t = jnp.transpose(w_enc).astype(weight_dtype)   # (n_embd, h_dim)
    w_dec_t = jnp.transpose(w_dec).astype(weight_dtype)   # (h_dim, n_embd)
    b_enc_eff = (b_enc.astype(jnp.float32)
                 - jnp.dot(b_dec.astype(jnp.float32),
                           w_enc_t.astype(jnp.float32),
                           preferred_element_type=jnp.float32,
                           precision=jax.lax.Precision.HIGHEST))
    return w_enc_t, b_enc_eff, w_dec_t, b_dec


@functools.partial(jax.jit,
                   static_argnames=("block_rows", "block_hidden", "hidden_dtype"))
def sae_forward(x, w_enc_t, b_enc_eff, w_dec_t, b_dec, *,
                block_rows=512, block_hidden=1024, hidden_dtype=None):
    """SAE forward.

    x:         (..., n_embd)
    w_enc_t:   (n_embd, h_dim)   enc.weight.T  (pre-transposed, see prepare_sae_params)
    b_enc_eff: (h_dim,)          folded encoder bias (f32)
    w_dec_t:   (h_dim, n_embd)   dec.weight.T
    b_dec:     (n_embd,)
    Returns (out, hidden): out shaped like x (x.dtype), hidden (..., h_dim)
    in hidden_dtype (defaults to x.dtype).
    """
    orig_shape = x.shape
    n_embd = orig_shape[-1]
    h_dim = w_enc_t.shape[1]
    hid_dtype = x.dtype if hidden_dtype is None else hidden_dtype

    x2d = x.reshape(-1, n_embd)
    n_rows = x2d.shape[0]

    # ---- dtype sizes ---------------------------------------------------------
    x_isz = jnp.dtype(x.dtype).itemsize
    o_isz = x_isz
    h_isz = jnp.dtype(hid_dtype).itemsize
    w_isz = jnp.dtype(w_enc_t.dtype).itemsize
    bd_isz = jnp.dtype(b_dec.dtype).itemsize

    # ---- tile selection ------------------------------------------------------
    row_align = 8 if x_isz >= 4 else 16
    n_cores = _num_tensorcores()

    if n_rows <= block_rows:
        bm = n_rows
        # >=2 row blocks so the "parallel" row axis can shard across TensorCores.
        if n_cores >= 2 and n_rows >= 2 * row_align:
            bm = _round_up(-(-n_rows // n_cores), row_align)
    else:
        bm = _round_down(max(block_rows, row_align), row_align)

    if h_dim <= block_hidden:
        bh = h_dim
    else:
        bh = _round_down(max(block_hidden, 128), 128)

    # ---- VMEM budget (from physical capacity, with headroom) -----------------
    vmem_cap = _vmem_capacity_bytes()
    budget = int(vmem_cap * 0.82)           # ~52 MiB on v7x, ~105 MiB on v5e/v6e

    def est(bm_, bh_):
        return int(
            2 * (bm_ * n_embd * x_isz       # x block (double-buffered)
                 + n_embd * bh_ * w_isz     # Wenc^T tile
                 + bh_ * 4                  # b_enc_eff tile (f32)
                 + bh_ * n_embd * w_isz     # Wdec^T tile
                 + n_embd * bd_isz          # b_dec
                 + bm_ * n_embd * o_isz     # out block
                 + bm_ * bh_ * h_isz)       # hidden block
            + bm_ * n_embd * 4)             # f32 accumulator scratch

    def with_headroom(b):
        return int(b * 1.2) + (2 << 20)

    # Shrink bh first (does not change total weight bytes), then bm.
    for _ in range(64):
        if with_headroom(est(bm, bh)) <= budget:
            break
        if bh > 512:
            bh = max(128, _round_down(bh // 2, 128))
        elif bm > row_align:
            bm = _round_down(bm // 2, row_align)
        elif bh > 128:
            bh = max(128, _round_down(bh // 2, 128))
        else:
            break

    # ---- hidden-axis padding (host-side zero pad, no in-kernel masking) ------
    if bh >= h_dim:
        bh = h_dim
        h_pad = h_dim
    else:
        bh = _round_down(bh, 128)
        h_pad = _round_up(h_dim, bh)

    if h_pad != h_dim:
        pad = h_pad - h_dim
        w_enc_t_k = jnp.pad(w_enc_t, ((0, 0), (0, pad)))
        b_enc_k = jnp.pad(b_enc_eff.astype(jnp.float32), ((0, pad),))
        w_dec_t_k = jnp.pad(w_dec_t, ((0, pad), (0, 0)))
    else:
        w_enc_t_k = w_enc_t
        b_enc_k = b_enc_eff.astype(jnp.float32)
        w_dec_t_k = w_dec_t

    b_enc2d = b_enc_k.reshape(1, h_pad)
    b_dec2d = b_dec.reshape(1, n_embd)

    n_row_blocks = -(-n_rows // bm)
    nh = h_pad // bh
    grid = (n_row_blocks, nh)

    vmem_limit = min(budget, max(with_headroom(est(bm, bh)), 8 << 20))

    cost = pl.CostEstimate(
        flops=4 * n_rows * n_embd * h_pad,  # two matmuls, 2 flops per MAC
        transcendentals=0,
        bytes_accessed=int(
            n_rows * n_embd * x_isz                       # read x
            + n_rows * n_embd * o_isz                     # write out
            + n_rows * h_pad * h_isz                      # write hidden
            + n_row_blocks * (n_embd * h_pad * 2 * w_isz  # weights per row block
                              + h_pad * 4 + n_embd * bd_isz)))

    out2d, hid2d = pl.pallas_call(
        _sae_kernel,
        out_shape=(
            jax.ShapeDtypeStruct((n_rows, n_embd), x.dtype),
            jax.ShapeDtypeStruct((n_rows, h_pad), hid_dtype),
        ),
        grid_spec=pltpu.PrefetchScalarGridSpec(
            num_scalar_prefetch=0,
            grid=grid,
            in_specs=[
                pl.BlockSpec((bm, n_embd), lambda i, j: (i, 0)),   # x rows
                pl.BlockSpec((n_embd, bh), lambda i, j: (0, j)),   # Wenc^T tile
                pl.BlockSpec((1, bh), lambda i, j: (0, j)),        # b_enc_eff
                pl.BlockSpec((bh, n_embd), lambda i, j: (j, 0)),   # Wdec^T tile
                pl.BlockSpec((1, n_embd), lambda i, j: (0, 0)),    # b_dec
            ],
            out_specs=[
                pl.BlockSpec((bm, n_embd), lambda i, j: (i, 0)),   # out (resident over j)
                pl.BlockSpec((bm, bh), lambda i, j: (i, j)),       # hidden
            ],
            scratch_shapes=[pltpu.VMEM((bm, n_embd), jnp.float32)],
        ),
        compiler_params=pltpu.CompilerParams(
            dimension_semantics=("parallel", "arbitrary"),
            vmem_limit_bytes=vmem_limit),
        cost_estimate=cost,
    )(x2d, w_enc_t_k, b_enc2d, w_dec_t_k, b_dec2d)

    if h_pad != h_dim:
        hid2d = hid2d[:, :h_dim]

    out = out2d.reshape(orig_shape)
    hidden = hid2d.reshape(orig_shape[:-1] + (h_dim,))
    return out, hidden


def init_sae_params(key, n_embd, h_dim):
    """Deterministic init mirroring SAE.__init__ (bias=True), PyTorch layout."""
    k_enc_w, k_enc_b, k_dec_b = jax.random.split(key, 3)

    # kaiming_uniform_(a=0, mode='fan_in', nonlinearity='relu') on (h_dim, n_embd)
    bound = jnp.sqrt(2.0) * jnp.sqrt(3.0 / n_embd)
    w_enc = jax.random.uniform(k_enc_w, (h_dim, n_embd), jnp.float32,
                               minval=-bound, maxval=bound)
    # Row-normalize enc.weight to unit L2 norm; dec.weight = enc.weight.T
    norms = jnp.sqrt(jnp.sum(w_enc * w_enc, axis=1, keepdims=True))
    w_enc = w_enc / norms
    w_dec = jnp.transpose(w_enc)              # (n_embd, h_dim)

    # nn.Linear default bias init: U(-1/sqrt(fan_in), 1/sqrt(fan_in))
    enc_bias_bound = 1.0 / jnp.sqrt(n_embd)
    dec_bias_bound = 1.0 / jnp.sqrt(h_dim)
    b_enc = jax.random.uniform(k_enc_b, (h_dim,), jnp.float32,
                               minval=-enc_bias_bound, maxval=enc_bias_bound)
    b_dec = jax.random.uniform(k_dec_b, (n_embd,), jnp.float32,
                               minval=-dec_bias_bound, maxval=dec_bias_bound)
    return w_enc, b_enc, w_dec, b_dec


if __name__ == "__main__":
    key = jax.random.PRNGKey(0)
    k_x, k_p = jax.random.split(key)

    # Small shapes consistent with the module: (batch, seq, n_embd), h_dim > n_embd.
    batch, seq, n_embd, h_dim = 2, 64, 128, 512
    x = jax.random.normal(k_x, (batch, seq, n_embd), jnp.float32)

    w_enc, b_enc, w_dec, b_dec = init_sae_params(k_p, n_embd, h_dim)
    # One-time weight prep (pre-transpose, bf16 cast, bias fold) off the hot path.
    w_enc_t, b_enc_eff, w_dec_t, b_dec_k = prepare_sae_params(w_enc, b_enc, w_dec, b_dec)

    # Run 1: small blocks so both grid axes are exercised (2 row blocks x 4 h tiles).
    out, hidden = sae_forward(x, w_enc_t, b_enc_eff, w_dec_t, b_dec_k,
                              block_rows=64, block_hidden=128)
    # Run 2: default (large) block configuration.
    out_d, hidden_d = sae_forward(x, w_enc_t, b_enc_eff, w_dec_t, b_dec_k)
    jax.block_until_ready((out, hidden, out_d, hidden_d))

    # Matched-precision reference: same bf16 quantization of weights/activations
    # as the kernel, f32 accumulation.
    f32 = jnp.float32
    hi = jax.lax.Precision.HIGHEST
    wef = w_enc_t.astype(f32)
    wdf = w_dec_t.astype(f32)
    xq = x.astype(w_enc_t.dtype).astype(f32)
    hidden_ref = jnp.maximum(
        jnp.einsum("bse,eh->bsh", xq, wef, precision=hi) + b_enc_eff, 0.0)
    hq = hidden_ref.astype(w_dec_t.dtype).astype(f32)
    out_ref = jnp.einsum("bsh,he->bse", hq, wdf, precision=hi) + b_dec

    for o, h in ((out, hidden), (out_d, hidden_d)):
        assert o.shape == (batch, seq, n_embd)
        assert h.shape == (batch, seq, h_dim)
        assert jnp.allclose(o, out_ref, atol=5e-4, rtol=5e-4)
        assert jnp.allclose(h, hidden_ref, atol=5e-4, rtol=5e-4)

    # Sanity check against the original full-f32 PyTorch formula (loose tolerance
    # covers the bf16 weight/activation quantization).
    hidden_f32 = jnp.maximum((x - b_dec) @ w_enc.T + b_enc, 0.0)
    out_f32 = hidden_f32 @ w_dec.T + b_dec
    assert jnp.allclose(out, out_f32, atol=1e-1, rtol=5e-2)
    assert jnp.allclose(hidden, hidden_f32, atol=1e-1, rtol=5e-2)

    print("KERNEL_OK")
</pallas_src>

<mosaic_0001>
module attributes {stable_mosaic.version = 11 : i64} {
  func.func @_sae_kernel(%arg0: i32, %arg1: i32, %arg2: memref<64x128xf32, #tpu.memory_space<vmem>>, %arg3: memref<128x128xbf16, #tpu.memory_space<vmem>>, %arg4: memref<1x128xf32, #tpu.memory_space<vmem>>, %arg5: memref<128x128xbf16, #tpu.memory_space<vmem>>, %arg6: memref<1x128xf32, #tpu.memory_space<vmem>>, %arg7: memref<64x128xf32, #tpu.memory_space<vmem>>, %arg8: memref<64x128xf32, #tpu.memory_space<vmem>>, %arg9: memref<64x128xf32, #tpu.memory_space<vmem>>) attributes {dimension_semantics = [#tpu.dimension_semantics<parallel>, #tpu.dimension_semantics<arbitrary>], iteration_bounds = array<i64: 2, 4>, scalar_prefetch = 0 : i64, scratch_operands = 1 : i64, tpu.core_type = #tpu.core_type<tc>, window_params = [{transform_indices = @transform_0, window_bounds = array<i64: 64, 128>}, {transform_indices = @transform_1, window_bounds = array<i64: 128, 128>}, {transform_indices = @transform_2, window_bounds = array<i64: 1, 128>}, {transform_indices = @transform_3, window_bounds = array<i64: 128, 128>}, {pipeline_mode = #tpu.pipeline_mode<synchronous>, transform_indices = @transform_4, window_bounds = array<i64: 1, 128>}, {transform_indices = @transform_5, window_bounds = array<i64: 64, 128>}, {transform_indices = @transform_6, window_bounds = array<i64: 64, 128>}]} {
    %c0 = arith.constant 0 : index
    %c0_0 = arith.constant 0 : index
    %0 = vector.load %arg2[%c0, %c0_0] : memref<64x128xf32, #tpu.memory_space<vmem>>, vector<64x128xf32>
    %1 = arith.truncf %0 : vector<64x128xf32> to vector<64x128xbf16>
    %c0_1 = arith.constant 0 : index
    %c0_2 = arith.constant 0 : index
    %2 = vector.load %arg3[%c0_1, %c0_2] : memref<128x128xbf16, #tpu.memory_space<vmem>>, vector<128x128xbf16>
    %cst = arith.constant dense<0.000000e+00> : vector<64x128xf32>
    %3 = tpu.matmul %1, %2, %cst {dimension_numbers = #tpu.dot_dimension_numbers<[1], [0], [0], [1], [0, 0, 1, 1], [], []>} : vector<64x128xbf16>, vector<128x128xbf16>, vector<64x128xf32> -> vector<64x128xf32>
    %c0_3 = arith.constant 0 : index
    %c0_4 = arith.constant 0 : index
    %4 = vector.load %arg4[%c0_3, %c0_4] : memref<1x128xf32, #tpu.memory_space<vmem>>, vector<1x128xf32>
    %5 = vector.broadcast %4 : vector<1x128xf32> to vector<64x128xf32>
    %6 = arith.addf %3, %5 : vector<64x128xf32>
    %cst_5 = arith.constant 0.000000e+00 : f32
    %7 = vector.broadcast %cst_5 : f32 to vector<64x128xf32>
    %8 = arith.maximumf %6, %7 : vector<64x128xf32>
    %c0_6 = arith.constant 0 : index
    %c0_7 = arith.constant 0 : index
    %9 = vector.load %arg8[%c0_6, %c0_7] : memref<64x128xf32, #tpu.memory_space<vmem>>, vector<64x128xf32>
    tpu.vector_store %arg8[%c0_6, %c0_7], %8 {strides = array<i32>} : memref<64x128xf32, #tpu.memory_space<vmem>>, vector<64x128xf32>,
    %c0_i32 = arith.constant 0 : i32
    %10 = arith.cmpi eq, %arg1, %c0_i32 : i32
    %11 = arith.extui %10 : i1 to i32
    %c0_i32_8 = arith.constant 0 : i32
    %12 = arith.cmpi ne, %11, %c0_i32_8 : i32
    scf.if %12 {
      %cst_17 = arith.constant 0.000000e+00 : f32
      %22 = vector.broadcast %cst_17 : f32 to vector<64x128xf32>
      %c0_18 = arith.constant 0 : index
      %c0_19 = arith.constant 0 : index
      %23 = vector.load %arg9[%c0_18, %c0_19] : memref<64x128xf32, #tpu.memory_space<vmem>>, vector<64x128xf32>
      tpu.vector_store %arg9[%c0_18, %c0_19], %22 {strides = array<i32>} : memref<64x128xf32, #tpu.memory_space<vmem>>, vector<64x128xf32>,
    } else {
    }
    %c0_9 = arith.constant 0 : index
    %c0_10 = arith.constant 0 : index
    %13 = vector.load %arg9[%c0_9, %c0_10] : memref<64x128xf32, #tpu.memory_space<vmem>>, vector<64x128xf32>
    %14 = arith.truncf %8 : vector<64x128xf32> to vector<64x128xbf16>
    %c0_11 = arith.constant 0 : index
    %c0_12 = arith.constant 0 : index
    %15 = vector.load %arg5[%c0_11, %c0_12] : memref<128x128xbf16, #tpu.memory_space<vmem>>, vector<128x128xbf16>
    %cst_13 = arith.constant dense<0.000000e+00> : vector<64x128xf32>
    %16 = tpu.matmul %14, %15, %cst_13 {dimension_numbers = #tpu.dot_dimension_numbers<[1], [0], [0], [1], [0, 0, 1, 1], [], []>} : vector<64x128xbf16>, vector<128x128xbf16>, vector<64x128xf32> -> vector<64x128xf32>
    %17 = arith.addf %13, %16 : vector<64x128xf32>
    %c0_14 = arith.constant 0 : index
    %c0_15 = arith.constant 0 : index
    %18 = vector.load %arg9[%c0_14, %c0_15] : memref<64x128xf32, #tpu.memory_space<vmem>>, vector<64x128xf32>
    tpu.vector_store %arg9[%c0_14, %c0_15], %17 {strides = array<i32>} : memref<64x128xf32, #tpu.memory_space<vmem>>, vector<64x128xf32>,
    %c3_i32 = arith.constant 3 : i32
    %19 = arith.cmpi eq, %arg1, %c3_i32 : i32
    %20 = arith.extui %19 : i1 to i32
    %c0_i32_16 = arith.constant 0 : i32
    %21 = arith.cmpi ne, %20, %c0_i32_16 : i32
    scf.if %21 {
      %c0_17 = arith.constant 0 : index
      %c0_18 = arith.constant 0 : index
      %22 = vector.load %arg9[%c0_17, %c0_18] : memref<64x128xf32, #tpu.memory_space<vmem>>, vector<64x128xf32>
      %c0_19 = arith.constant 0 : index
      %c0_20 = arith.constant 0 : index
      %23 = vector.load %arg6[%c0_19, %c0_20] : memref<1x128xf32, #tpu.memory_space<vmem>>, vector<1x128xf32>
      %24 = vector.broadcast %23 : vector<1x128xf32> to vector<64x128xf32>
      %25 = arith.addf %22, %24 : vector<64x128xf32>
      %c0_21 = arith.constant 0 : index
      %c0_22 = arith.constant 0 : index
      %26 = vector.load %arg7[%c0_21, %c0_22] : memref<64x128xf32, #tpu.memory_space<vmem>>, vector<64x128xf32>
      tpu.vector_store %arg7[%c0_21, %c0_22], %25 {strides = array<i32>} : memref<64x128xf32, #tpu.memory_space<vmem>>, vector<64x128xf32>,
    } else {
    }
    return
  }
  func.func @transform_0(%arg0: i32, %arg1: i32) -> (i32, i32) {
    %c0_i32 = arith.constant 0 : i32
    %c0_i32_0 = arith.constant 0 : i32
    return %arg0, %c0_i32 : i32, i32
  }
  func.func @transform_1(%arg0: i32, %arg1: i32) -> (i32, i32) {
    %c0_i32 = arith.constant 0 : i32
    %c0_i32_0 = arith.constant 0 : i32
    return %c0_i32, %arg1 : i32, i32
  }
  func.func @transform_2(%arg0: i32, %arg1: i32) -> (i32, i32) {
    %c0_i32 = arith.constant 0 : i32
    %c0_i32_0 = arith.constant 0 : i32
    return %c0_i32, %arg1 : i32, i32
  }
  func.func @transform_3(%arg0: i32, %arg1: i32) -> (i32, i32) {
    %c0_i32 = arith.constant 0 : i32
    %c0_i32_0 = arith.constant 0 : i32
    return %arg1, %c0_i32 : i32, i32
  }
  func.func @transform_4(%arg0: i32, %arg1: i32) -> (i32, i32) {
    %c0_i32 = arith.constant 0 : i32
    %c0_i32_0 = arith.constant 0 : i32
    %c0_i32_1 = arith.constant 0 : i32
    return %c0_i32, %c0_i32_0 : i32, i32
  }
  func.func @transform_5(%arg0: i32, %arg1: i32) -> (i32, i32) {
    %c0_i32 = arith.constant 0 : i32
    %c0_i32_0 = arith.constant 0 : i32
    return %arg0, %c0_i32 : i32, i32
  }
  func.func @transform_6(%arg0: i32, %arg1: i32) -> (i32, i32) {
    %c0_i32 = arith.constant 0 : i32
    return %arg0, %arg1 : i32, i32
  }
}

</mosaic_0001>

<bundles_post_ra>
// kernel: sae_forward.1
= control target key start
LH: loop header
LB: loop body
LE: loop exit
PB: predicated region body
PF: predicated region fallthrough
CT: control target
= control target key end

     0   :  { %s2106_s0 = inlined_call_operand.hbm [shape: f32[128,128], index: 0, kind: input, shape index: {}]   ;;  %s2107_s1 = inlined_call_operand.hbm [shape: bf16[128,512], index: 1, kind: input, shape index: {}]   ;;  %s2108_s2 = inlined_call_operand.vmem [shape: f32[1,512], index: 2, kind: input, shape index: {}]   ;;  %s2109_s3 = inlined_call_operand.hbm [shape: bf16[512,128], index: 3, kind: input, shape index: {}]   ;;  %s2110_s4 = inlined_call_operand.vmem [shape: f32[1,128], index: 4, kind: input, shape index: {}]   ;;  %s2111_s5 = inlined_call_operand.hbm [shape: f32[128,128], index: 5, kind: output, shape index: {0}]   ;;  %s2112_s6 = inlined_call_operand.hbm [shape: f32[128,512], index: 6, kind: output, shape index: {1}]  }
   0x1   :  { %2135 = sst [smem:[#allocation28_spill]] %s2106_s0 }
   0x2   :  { %2136 = sst [smem:[#allocation29_spill]] %s2107_s1 }
   0x3   :  { %2137 = sst [smem:[#allocation30_spill]] %s2108_s2 }
   0x4   :  { %2138 = sst [smem:[#allocation31_spill]] %s2109_s3 }
   0x5   :  { %2139 = sst [smem:[#allocation32_spill]] %s2110_s4 }
   0x6   :  { %2140 = sst [smem:[#allocation33_spill]] %s2111_s5 }
   0x7   :  { %2141 = sst [smem:[#allocation34_spill]] %s2112_s6 }
   0x8   :  { %12 = vsyncpa [#allocation4], 0 }
   0x9   :  { %14 = vsyncpa [#allocation4 + $0x1], 0 }
   0xa   :  { %15 = vsyncpa [#allocation7], 0 }
   0xb   :  { %17 = vsyncpa [#allocation7 + $0x1], 0 }
   0xc   :  { %18 = vsyncpa [#allocation5], 0 }
   0xd   :  { %20 = vsyncpa [#allocation5 + $0x1], 0 }
   0xe   :  { %21 = vsyncpa [#allocation11], 0 }
   0xf   :  { %23 = vsyncpa [#allocation11 + $0x1], 0  ;;  %s1577_s21 = smov 0   ;;  %s1579_s22 = smov 0  }
  0x10   :  { %s1581_s23 = smov 0   ;;  %s1583_s24 = smov 0  }
  0x11   :  { %s1585_s25 = smov 0   ;;  %s1587_s26 = smov 0  }
  0x12   :  { %s1589_s27 = smov 0   ;;  %s1591_s28 = smov 0  }
  0x13   :  { %s1593_s29 = smov 0   ;;  %s1595_s30 = smov 0  }
  0x14   :  { %s1597_s7 = smov 0   ;;  %s1599_s8 = smov 0  }
  0x15   :  { %s1601_s9 = smov 0   ;;  %s1603_s10 = smov 0  }
  0x16 LB: > { %2142 = sst [smem:[#allocation16_spill]] %s1494_s26  ;;  %s2113_s11 = sadd.s32 1, %s1518_s8  ;;  %s1526_s10 = sphi %s1603_s10, %s29_s10   ;;  %s1522_s9 = sphi %s1601_s9, %s2203_s9   ;;  %s1518_s8 = sphi %s1599_s8, %s2213_s8   ;;  %s1514_s7 = sphi %s1597_s7, %s2201_s7   ;;  %s1510_s30 = sphi %s1595_s30, %s2212_s30   ;;  %s1506_s29 = sphi %s1593_s29, %s2211_s29   ;;  %s1502_s28 = sphi %s1591_s28, %s2210_s28   ;;  %s1498_s27 = sphi %s1589_s27, %s2209_s27   ;;  %s1494_s26 = sphi %s1587_s26, %s2198_s26   ;;  %s1490_s25 = sphi %s1585_s25, %s2208_s25   ;;  %s1486_s24 = sphi %s1583_s24, %s2207_s24   ;;  %s1482_s23 = sphi %s1581_s23, %s2206_s23   ;;  %s1478_s22 = sphi %s1579_s22, %s2205_s22   ;;  %s1474_s21 = sphi %s1577_s21, %s2204_s21  }
  0x17   : > { %2143 = sst [smem:[#allocation17_spill]] %s1506_s29  ;;  %p2118_p0 = scmp.eq.s32.totalorder %s1526_s10, 0 }
  0x18   : > { %2144 = sst [smem:[#allocation18_spill]] %s1510_s30  ;;  %p1651_p1 = scmp.ge.s32.totalorder %s2113_s11, 4 }
  0x19   : > { %2145 = sst [smem:[#allocation19_spill]] %s1514_s7  ;;  %p81_p2 = scmp.ne.s32.totalorder %s1494_s26, %s1490_s25 }
  0x1a   : > { %2146 = sst [smem:[#allocation20_spill]] %s1522_s9  ;;  %p2117_p4 = scmp.lt.s32.totalorder %s1526_s10, 8 }
  0x1b   : > { %p83_p5 = por %p81_p2, %p2118_p0  ;;  %s262_s14 = sand.u32 1, %s1526_s10  }
  0x1c   : > { %s264_s15 = sand.u32 1, %s1494_s26   ;;  %s973_s17 = sshll.u32 %s1518_s8, 6 }
  0x1d   : > { %s1665_s16 = sshll.u32 %s264_s15, 6  ;;  %s2148_s1 = sld [smem:[#allocation29_spill]] }
  0x1e   : > { %s266_s13 = scalar_lea.vmem [#allocation6], %s1665_s16  ;;  %p1676_p6 = pnand %p2117_p4, %p83_p5 }
  0x1f   : > { %s272_s11 = sshll.u32 %s266_s13, 4  ;;  %s1683_s15 = scalar_lea.sflag [#allocation7], %s262_s14  ;;  %s1680_s11 = int_to_ptr.vmem [resolvable:$true] %s272_s11 }
  0x20   : > { %p2123_p9 = pneg %p1676_p6 }
  0x23   : > { %s1671_s20 = scalar_lea.hbm %s2148_s1, %s973_s17  ;;  %s1259_s19 = scalar_lea.hbm %s2148_s1, 4096 }
  0x24   : > { %s1254_s17 = scalar_lea.hbm %s1671_s20, 1024  ;;  %p1260_p12 = scmp.lt.u32.totalorder %s1671_s20, %s2148_s1 }
  0x25   : > { %p1255_p8 = scmp.ne.s32.totalorder %s1671_s20, %s1254_s17  ;;  %p1261_p13 = scmp.lt.u32.totalorder %s1259_s19, %s1254_s17 }
  0x26   : > { %p1263_p5 = scmp.lt.u32.totalorder %s1254_s17, %s1671_s20 }
  0x27   : > { %p1257_p10 = pnand %p2123_p9, %p1255_p8  ;;  %p1262_p2 = por %p1261_p13, %p1260_p12 }
  0x29   : > { %p1258_p11 = pneg %p1257_p10  ;;  %p1264_p4 = por %p1263_p5, %p1262_p2 }
  0x2b   : > { %p1265_p3 = pnand %p1264_p4, %p1258_p11 }
  0x2d   : > { %1268 = shalt.err (!%p1265_p3)
}
  0x2e   : > { %s1269_s14 = scalar_lea.vmem %s1680_s11, 1024  ;;  %s1528_s13 = smov [#allocation6]  }
  0x2f   : > { %p1270_p8 = scmp.ne.s32.totalorder %s1680_s11, %s1269_s14  ;;  %s1274_s18 = sshll.u32 %s1528_s13, 4  ;;  %s1275_s18 = int_to_ptr.vmem [resolvable:$false] %s1274_s18 }
  0x30   : > { %s1276_s5 = scalar_lea.vmem %s1275_s18, 2048  ;;  %p1277_p7 = scmp.lt.s32.totalorder %s1680_s11, %s1275_s18 }
  0x31   : > { %p1272_p10 = pnand %p1270_p8, %p2123_p9  ;;  %p1278_p12 = scmp.lt.s32.totalorder %s1276_s5, %s1269_s14 }
  0x33   : > { %p1273_p0 = pneg %p1272_p10  ;;  %p1279_p13 = por %p1278_p12, %p1277_p7 }
  0x35   : > { %p1280_p2 = pnand %p1279_p13, %p1273_p0 }
  0x37   : > { %1283 = shalt.err (!%p1280_p2)
}
  0x38   : > { %s1529_s7 = smov 256   ;;  %s2119_s17 = smov 64  }
  0x39   : > { %s2120_s19 = smov 4   ;;  %p307_p0 = scmp.lt.s32.totalorder %s1526_s10, 9 }
  0x3a   : > { %1104 = dma.hbm_to_vmem [thread:$0]  (!%p1676_p6), %s1671_s20, 1024, %s1680_s11, %s1683_s15, %s1529_s7, %s2119_s17, %s2120_s19  }
  0x3b   : > { %p2150_p3 = scmp.ge.s32.totalorder %s1526_s10, 1  ;;  %s1721_s13 = sadd.s32 4294967295, %s1526_s10  }
  0x3c   : > { %s966_s18 = sadd.s32 4294967294, %s1526_s10   ;;  %s2152_s5 = sadd.s32 1, %s1518_s8 }
  0x3d   : > { %p1716_p4 = pnand %p2150_p3, %p307_p0  ;;  %s2215_s5 = smov (%p1651_p1, %s2152_s5), 0 }
  0x3e   : > { %2153 = sst [smem:[#allocation21_spill]] %s2215_s5  ;;  %s41_s11 = sadd.s32 1, %s1522_s9 }
  0x3f   : > { %s2151_s14 = scalar_select %p1716_p4, 1, 0 }
  0x40   : > { %s48_s20 = sadd.s32 1, %s1506_s29  ;;  %s2217_s11 = smov (!%p1651_p1, %s41_s11), %s1522_s9 }
  0x41   : > { %p55_p7 = scmp.ne.s32.totalorder %s1506_s29, %s1502_s28  ;;  %p61_p11 = scmp.ne.s32.totalorder %s1502_s28, %s1498_s27 }
  0x42   : > { %p43_p5 = scmp.ge.s32.totalorder %s2217_s11, 2  ;;  %p62_p8 = scmp.eq.s32.totalorder %s1721_s13, 0 }
  0x43   : > { %p2154_p10 = scmp.eq.s32.totalorder %s1526_s10, 0  ;;  %s71_s17 = ssub.s32 %s1518_s8, %s2215_s5 }
  0x44   : > { %s2219_s11 = smov (%p43_p5, %s2217_s11), 0  ;;  %p1756_p1 = por %p62_p8, %p61_p11 }
  0x45   : > { %p1745_p12 = por %p2154_p10, %p55_p7  ;;  %2156 = sst [smem:[#allocation22_spill]] %s2219_s11 }
  0x46   : > { %s2157_s12 = scalar_select %p1756_p1, 1, 0 }
  0x47   : > { %p72_p13 = scmp.eq.s32.totalorder %s71_s17, 0  ;;  %s45_s19 = ssub.s32 %s1522_s9, %s2219_s11 }
  0x48   : > { %p2158_p2 = scmp.ne.s32.totalorder %s1490_s25, %s1486_s24  ;;  %p46_p3 = scmp.eq.s32.totalorder %s45_s19, 0 }
  0x49   : > { %p184_p5 = scmp.eq.s32.totalorder %s1721_s13, 7  ;;  %s2161_s5 = sadd.s32 1, %s1494_s26 }
  0x4a   : > { %p1765_p0 = por %p2158_p2, %p62_p8  ;;  %p190_p9 = scmp.eq.s32.totalorder %s966_s18, 7 }
  0x4b   : > { %s1773_s4 = scalar_select %p72_p13, %s1494_s26, %s2161_s5  }
  0x4c   : > { %s2159_s1 = scalar_select %p1765_p0, 1, 0 }
  0x4d   : > { %2162 = sst [smem:[#allocation24_spill]] %s1773_s4  ;;  %p1781_p10 = por %p184_p5, %p55_p7 }
  0x4e   : > { %2160 = sst [smem:[#allocation23_spill]] %s2159_s1  ;;  %s198_s24 = sor.u32 %s71_s17, %s45_s19 }
  0x4f   : > { %s1776_s2 = scalar_select %p46_p3, %s1506_s29, %s48_s20  }
  0x50   : > { %s2164_s30 = scalar_select %p1781_p10, 1, 0 }
  0x51   : > { %2163 = sst [smem:[#allocation25_spill]] %s1776_s2  ;;  %s201_s11 = sadd.s32 1, %s1482_s23 }
  0x52   : > { %p1789_p8 = por %p190_p9, %p61_p11  ;;  %p199_p2 = scmp.eq.s32.totalorder %s198_s24, 0 }
  0x53   : > { %p211_p13 = scmp.ne.s32.totalorder %s1482_s23, %s1478_s22  ;;  %p217_p0 = scmp.ne.s32.totalorder %s1478_s22, %s1474_s21 }
  0x54   : > { %s2165_s1 = scalar_select %p1789_p8, 1, 0 }
  0x55   : > { %s1798_s5 = scalar_select %p199_p2, %s1482_s23, %s201_s11  }
  0x56   : > { %2166 = sst [smem:[#allocation26_spill]] %s2165_s1  ;;  %p1800_p3 = por %p211_p13, %p184_p5 }
  0x57   : > { %2167 = sst [smem:[#allocation27_spill]] %s1798_s5  ;;  %p1804_p7 = por %p217_p0, %p190_p9 }
  0x58   : > { %s2168_s20 = scalar_select %p1800_p3, 1, 0 }
  0x59   : > { %s2169_s18 = scalar_select %p1804_p7, 1, 0 }
  0x5a   : > { %s241_s17 = sand.u32 1, %s1506_s29   ;;  %s1012_s19 = sshll.u32 %s1522_s9, 10 }
  0x5b   : > { %s969_s2 = sshll.u32 %s241_s17, 6  ;;  %s2170_s0 = sld [smem:[#allocation28_spill]] }
  0x5c   : > { %s245_s11 = scalar_lea.vmem [#allocation3], %s969_s2  ;;  %p2171_p11 = scmp.lt.s32.totalorder %s1526_s10, 8 }
  0x5d   : > { %s252_s24 = sshll.u32 %s245_s11, 4  ;;  %s1825_s9 = scalar_lea.sflag [#allocation4], %s241_s17  ;;  %s1823_s24 = int_to_ptr.vmem [resolvable:$true] %s252_s24 }
  0x5e   : > { %p1819_p9 = pnand %p2171_p11, %p1745_p12 }
  0x60   : > { %p1286_p5 = pneg %p1819_p9 }
  0x61   : > { %s1813_s1 = scalar_lea.hbm %s2170_s0, %s1012_s19  ;;  %s1289_s7 = scalar_lea.hbm %s2170_s0, 2048 }
  0x62   : > { %s1284_s4 = scalar_lea.hbm %s1813_s1, 1024  ;;  %p1290_p12 = scmp.lt.u32.totalorder %s1813_s1, %s2170_s0 }
  0x63   : > { %p1285_p0 = scmp.ne.s32.totalorder %s1813_s1, %s1284_s4  ;;  %p1291_p11 = scmp.lt.u32.totalorder %s1289_s7, %s1284_s4 }
  0x64   : > { %p1293_p8 = scmp.lt.u32.totalorder %s1284_s4, %s1813_s1 }
  0x65   : > { %p1287_p2 = pnand %p1286_p5, %p1285_p0  ;;  %p1292_p7 = por %p1291_p11, %p1290_p12 }
  0x67   : > { %p1288_p13 = pneg %p1287_p2  ;;  %p1294_p3 = por %p1293_p8, %p1292_p7 }
  0x69   : > { %p1295_p10 = pnand %p1294_p3, %p1288_p13 }
  0x6b   : > { %1298 = shalt.err (!%p1295_p10)
}
  0x6c   : > { %s1299_s17 = scalar_lea.vmem %s1823_s24, 1024  ;;  %s1532_s2 = smov [#allocation3]  }
  0x6d   : > { %p1300_p0 = scmp.ne.s32.totalorder %s1823_s24, %s1299_s17  ;;  %s1304_s26 = sshll.u32 %s1532_s2, 4  ;;  %s1305_s26 = int_to_ptr.vmem [resolvable:$false] %s1304_s26 }
  0x6e   : > { %s1306_s19 = scalar_lea.vmem %s1305_s26, 2048  ;;  %p1307_p4 = scmp.lt.s32.totalorder %s1823_s24, %s1305_s26 }
  0x6f   : > { %p1302_p2 = pnand %p1300_p0, %p1286_p5  ;;  %p1308_p12 = scmp.lt.s32.totalorder %s1306_s19, %s1299_s17 }
  0x71   : > { %p1303_p1 = pneg %p1302_p2  ;;  %p1309_p11 = por %p1308_p12, %p1307_p4 }
  0x73   : > { %p1310_p8 = pnand %p1309_p11, %p1303_p1 }
  0x75   : > { %1313 = shalt.err (!%p1310_p8)
}
  0x76   : > { %s1533_s4 = smov 128   ;;  %s1534_s7 = smov 8  }
  0x77   : > { %1101 = dma.hbm_to_vmem [thread:$0]  (!%p1819_p9), %s1813_s1, 1024, %s1823_s24, %s1825_s9, %s1533_s4, %s1533_s4, %s1534_s7  }
  0x78   : > { %s1013_s11 = sshll.u32 %s1518_s8, 10  ;;  %s2173_s3 = sld [smem:[#allocation31_spill]] }
  0x79   : > { %s292_s17 = scalar_lea.vmem [#allocation8], %s1665_s16  ;;  %p2174_p1 = pneg %p1676_p6 }
  0x7a   : > { %s299_s19 = sshll.u32 %s292_s17, 4  ;;  %s1860_s19 = int_to_ptr.vmem [resolvable:$true] %s299_s19 }
  0x7e   : > { %s1857_s26 = scalar_lea.hbm %s2173_s3, %s1013_s11  ;;  %s1319_s0 = scalar_lea.hbm %s2173_s3, 4096 }
  0x7f   : > { %s1314_s29 = scalar_lea.hbm %s1857_s26, 1024  ;;  %p1320_p7 = scmp.lt.u32.totalorder %s1857_s26, %s2173_s3 }
  0x80   : > { %p1315_p4 = scmp.ne.s32.totalorder %s1857_s26, %s1314_s29  ;;  %p1321_p9 = scmp.lt.u32.totalorder %s1319_s0, %s1314_s29 }
  0x81   : > { %p1323_p13 = scmp.lt.u32.totalorder %s1314_s29, %s1857_s26 }
  0x82   : > { %p1317_p10 = pnand %p1315_p4, %p2174_p1  ;;  %p1322_p5 = por %p1321_p9, %p1320_p7 }
  0x84   : > { %p1318_p3 = pneg %p1317_p10  ;;  %p1324_p0 = por %p1323_p13, %p1322_p5 }
  0x86   : > { %p1325_p2 = pnand %p1324_p0, %p1318_p3 }
  0x88   : > { %1328 = shalt.err (!%p1325_p2)
}
  0x89   : > { %s1329_s16 = scalar_lea.vmem %s1860_s19, 1024  ;;  %p2175_p11 = pmov %p2174_p1 }
  0x8a   : > { %p1330_p12 = scmp.ne.s32.totalorder %s1860_s19, %s1329_s16  ;;  %s1535_s4 = smov [#allocation8]  }
  0x8b   : > { %s1334_s7 = sshll.u32 %s1535_s4, 4  ;;  %s1335_s7 = int_to_ptr.vmem [resolvable:$false] %s1334_s7 }
  0x8c   : > { %p1332_p8 = pnand %p1330_p12, %p2175_p11  ;;  %s1336_s11 = scalar_lea.vmem %s1335_s7, 2048 }
  0x8d   : > { %p1337_p1 = scmp.lt.s32.totalorder %s1860_s19, %s1335_s7  ;;  %p1338_p10 = scmp.lt.s32.totalorder %s1336_s11, %s1329_s16 }
  0x8e   : > { %p1333_p4 = pneg %p1332_p8 }
  0x8f   : > { %p1339_p7 = por %p1338_p10, %p1337_p1 }
  0x91   : > { %p1340_p9 = pnand %p1339_p7, %p1333_p4 }
  0x93   : > { %1343 = shalt.err (!%p1340_p9)
}
  0x94   : > { %s2176_s29 = smov 4   ;;  %s2177_s2 = smov 64  }
  0x95   : > { %1107 = dma.hbm_to_vmem [thread:$0]  (!%p1676_p6), %s1857_s26, 1024, %s1860_s19, %s1683_s15, %s2177_s2, %s2177_s2, %s2176_s29  }
  0x96   : > { %p2178_p3 = scmp.ne.s32.totalorder %s2151_s14, 0 }
  0x97   : > { %s1892_s17 = sand.u32 (!%p2178_p3), 1, %s1502_s28   ;;  %p2179_p5 = scmp.ne.s32.totalorder (!%p2178_p3), %s2157_s12, 0 }
  0x98   : > { %311 = sbr.rel (%p2178_p3) target bundleno = 756 (0x2f4), region = 40  ;;  %s978_s1 = sshll.u32 (!%p2178_p3), %s1892_s17, 6 }
  0x99   : > { %s314_s9 = scalar_lea.sflag (!%p2178_p3), [#allocation4], %s1892_s17  ;;  %s1898_s6 = scalar_lea.vmem (!%p2178_p3), [#allocation3], %s978_s1 }
  0x9f   : > { %1457 = dma.done.wait (%p2179_p5), %s314_s9, 1024  }
  0xa0   : > { %1459 = vsyncadd (%p2179_p5), %s314_s9, 4294966272  ;;  %s2180_s15 = sld [smem:[#allocation23_spill]]  ;;  %s322_s14 = sand.u32 1, %s1721_s13  }
  0xa1   : > { %s324_s26 = sand.u32 1, %s1490_s25   ;;  %s323_s0 = scalar_lea.sflag [#allocation7], %s322_s14 }
  0xa2   : > { %s1906_s19 = sshll.u32 %s324_s26, 6 }
  0xa3   : > { %s326_s5 = scalar_lea.vmem [#allocation6], %s1906_s19 }
  0xa6   : > { %p2181_p6 = scmp.ne.s32.totalorder %s2180_s15, 0 }
  0xa8   : > { %1461 = dma.done.wait (%p2181_p6), %s323_s0, 2048  }
  0xa9   : > { %1463 = vsyncadd (%p2181_p6), %s323_s0, 4294965248  ;;  %v1238_v0 = vld [vmem:[%s326_s5] sm:$0xff]   ;;  %v1239_v1 = vld [vmem:[%s326_s5 + $0x8] sm:$0xff]   ;;  %s2182_s13 = sld [smem:[#allocation18_spill]]  ;;  %s2183_s4 = sld [smem:[#allocation30_spill]] }
  0xaa   : > { %1040 = vmatprep.subr.bf16.mxu0 %v1238_v0  ;;  %v1240_v2 = vld [vmem:[%s326_s5 + $0x10] sm:$0xff]   ;;  %v1241_v3 = vld [vmem:[%s326_s5 + $0x18] sm:$0xff]   ;;  %v390_v4 = vld [vmem:[%s1898_s6] sm:$0xff]  ;;  %s379_s11 = sand.u32 1, %s1478_s22   ;;  %s1948_s9 = scalar_lea.vmem [#allocation8], %s1906_s19 }
  0xab   : > { %1041 = vmatpush3.bf16.msra.mxu0 %v1238_v0  ;;  %v391_v5 = vld [vmem:[%s1898_s6 + $0x8] sm:$0xff]  ;;  %v1242_v7 = vld [vmem:[%s326_s5 + $0x20] sm:$0xff]   ;;  %v1244_v9 = vld [vmem:[%s326_s5 + $0x30] sm:$0xff]   ;;  %s982_s29 = sshll.u32 %s379_s11, 6 }
  0xac   : > { %1042 = vmatprep.subr.bf16.mxu0 %v1239_v1  ;;  %v398_v6 = vpack.c.bf16 %v391_v5, %v390_v4  ;;  %v1243_v8 = vld [vmem:[%s326_s5 + $0x28] sm:$0xff]   ;;  %v1245_v10 = vld [vmem:[%s326_s5 + $0x38] sm:$0xff]   ;;  %v392_v11 = vld [vmem:[%s1898_s6 + $0x10] sm:$0xff]  ;;  %s1934_s2 = scalar_lea.vmem [#allocation10], %s982_s29 }
  0xad   : > { %v393_v12 = vld [vmem:[%s1898_s6 + $0x18] sm:$0xff]  ;;  %v394_v13 = vld [vmem:[%s1898_s6 + $0x20] sm:$0xff]  ;;  %v395_v14 = vld [vmem:[%s1898_s6 + $0x28] sm:$0xff] }
  0xae   : > { %1056 = vmatprep.mubr.bf16.mxu0 %v398_v6  ;;  %v399_v15 = vpack.c.bf16 %v393_v12, %v392_v11  ;;  %v400_v16 = vpack.c.bf16 %v395_v14, %v394_v13  ;;  %v396_v17 = vld [vmem:[%s1898_s6 + $0x30] sm:$0xff]  ;;  %v397_v18 = vld [vmem:[%s1898_s6 + $0x38] sm:$0xff]  ;;  %s1952_s6 = scalar_lea.vmem [#allocation9], %s978_s1 }
  0xaf   : > { %1043 = vmatpush3.bf16.msra.mxu0 %v1239_v1  ;;  %v401_v19 = vpack.c.bf16 %v397_v18, %v396_v17  ;;  %p383_p13 = scmp.lt.s32.totalorder %s2182_s13, 3  ;;  %p992_p0 = scmp.ne.s32.totalorder %s2182_s13, 0 }
  0xb0   : > { %1044 = vmatprep.subr.bf16.mxu0 %v1240_v2  ;;  %v1536_v45 = vmov (!%p992_p0), 0.0  }
  0xb1   : > { %s384_s12 = scalar_select %p383_p13, %s2182_s13, 3 }
  0xb2   : > { %558 = vst [vmem:[#allocation2] sm:$0xff] (!%p992_p0), %v1536_v45  ;;  %559 = vst [vmem:[#allocation2 + $0x8] sm:$0xff] (!%p992_p0), %v1536_v45 }
  0xb3   : > { %1045 = vmatpush3.bf16.msra.mxu0 %v1240_v2  ;;  %s385_s7 = scalar_lea.vmem %s2183_s4, %s384_s12  ;;  %560 = vst [vmem:[#allocation2 + $0x10] sm:$0xff] (!%p992_p0), %v1536_v45  ;;  %561 = vst [vmem:[#allocation2 + $0x18] sm:$0xff] (!%p992_p0), %v1536_v45 }
  0xb4   : > { %1046 = vmatprep.subr.bf16.mxu0 %v1241_v3  ;;  %v983_v20 = vld [vmem:[%s385_s7] ss:$0 sm:$0xff]  ;;  %562 = vst [vmem:[#allocation2 + $0x20] sm:$0xff] (!%p992_p0), %v1536_v45  ;;  %563 = vst [vmem:[#allocation2 + $0x28] sm:$0xff] (!%p992_p0), %v1536_v45 }
  0xb5   : > { %564 = vst [vmem:[#allocation2 + $0x30] sm:$0xff] (!%p992_p0), %v1536_v45  ;;  %565 = vst [vmem:[#allocation2 + $0x38] sm:$0xff] (!%p992_p0), %v1536_v45 }
  0xb7   : > { %1047 = vmatpush3.bf16.msra.mxu0 %v1241_v3 }
  0xb8   : > { %1048 = vmatprep.subr.bf16.mxu0 %v1242_v7 }
  0xbb   : > { %1049 = vmatpush3.bf16.msra.mxu0 %v1242_v7 }
  0xbc   : > { %1050 = vmatprep.subr.bf16.mxu0 %v1243_v8 }
  0xbf   : > { %1051 = vmatpush3.bf16.msra.mxu0 %v1243_v8 }
  0xc0   : > { %1052 = vmatprep.subr.bf16.mxu0 %v1244_v9 }
  0xc3   : > { %1053 = vmatpush3.bf16.msra.mxu0 %v1244_v9 }
  0xc4   : > { %1054 = vmatprep.subr.bf16.mxu0 %v1245_v10 }
  0xc7   : > { %1055 = vmatpush3.bf16.msra.mxu0 %v1245_v10 }
  0xca   : > { %1057 = vmatmul.mubr.bf16.vlgmr.msra.gmra.mrb[0].mxu0 %v399_v15 }
  0xcb   : > { %1060 = vmatprep.mubr.bf16.mxu0 %v400_v16 }
  0xd2   : > { %1061 = vmatmul.mubr.bf16.gmra.mrb[4].mxu0 %v401_v19 }
 0x19d   : > { %v1058_v21 = vpop.f32.mrb[0].mxu0 }
 0x19e   : > { %v1929_v22 = vadd.f32 %v1058_v21, %v983_v20  ;;  %v507_v23 = vpop.f32.mrb[1].mxu0 }
 0x19f   : > { %v508_v24 = vadd.f32 %v983_v20, %v507_v23  ;;  %v1059_v25 = vpop.f32.mrb[2].mxu0 }
 0x1a0   : > { %v540_v26 = vmax.f32 %v1929_v22, 0.0  ;;  %v1932_v27 = vadd.f32 %v1059_v25, %v983_v20  ;;  %v510_v28 = vpop.f32.mrb[3].mxu0 }
 0x1a1   : > { %v538_v29 = vmax.f32 %v508_v24, 0.0  ;;  %v511_v30 = vadd.f32 %v983_v20, %v510_v28 }
 0x1a2   : > { %548 = vst [vmem:[%s1934_s2 + $0x10] sm:$0xff] %v540_v26  ;;  %v541_v31 = vmax.f32 %v1932_v27, 0.0 }
 0x1a3   : > { %546 = vst [vmem:[%s1934_s2] sm:$0xff] %v538_v29  ;;  %v539_v32 = vmax.f32 %v511_v30, 0.0 }
 0x1a4   : > { %549 = vst [vmem:[%s1934_s2 + $0x18] sm:$0xff] %v541_v31 }
 0x1a5   : > { %547 = vst [vmem:[%s1934_s2 + $0x8] sm:$0xff] %v539_v32  ;;  %v1062_v33 = vpop.f32.mrb[4].mxu0 }
 0x1a6   : > { %v532_v34 = vadd.f32 %v1062_v33, %v983_v20  ;;  %v523_v35 = vpop.f32.mrb[5].mxu0 }
 0x1a7   : > { %v524_v36 = vadd.f32 %v983_v20, %v523_v35  ;;  %v1063_v37 = vpop.f32.mrb[6].mxu0  ;;  %557 = sbr.rel (%p992_p0) target bundleno = 430 (0x1ae), region = 56 }
 0x1a8   : > { %v544_v38 = vmax.f32 %v532_v34, 0.0  ;;  %v535_v39 = vadd.f32 %v1063_v37, %v983_v20  ;;  %v526_v40 = vpop.f32.mrb[7].mxu0 }
 0x1a9   : > { %v542_v41 = vmax.f32 %v524_v36, 0.0  ;;  %v527_v42 = vadd.f32 %v983_v20, %v526_v40 }
 0x1aa   : > { %552 = vst [vmem:[%s1934_s2 + $0x30] sm:$0xff] %v544_v38  ;;  %v545_v43 = vmax.f32 %v535_v39, 0.0 }
 0x1ab   : > { %550 = vst [vmem:[%s1934_s2 + $0x20] sm:$0xff] %v542_v41  ;;  %v543_v44 = vmax.f32 %v527_v42, 0.0 }
 0x1ac   : > { %553 = vst [vmem:[%s1934_s2 + $0x38] sm:$0xff] %v545_v43 }
 0x1ad   : > { %551 = vst [vmem:[%s1934_s2 + $0x28] sm:$0xff] %v543_v44 }
 0x1ae PF: > { %v1246_v46 = vld [vmem:[%s1948_s9] sm:$0xff]   ;;  %v574_v47 = vpack.c.bf16 %v539_v32, %v538_v29  ;;  %v1247_v48 = vld [vmem:[%s1948_s9 + $0x8] sm:$0xff]   ;;  %v1248_v49 = vld [vmem:[%s1948_s9 + $0x10] sm:$0xff]   ;;  %v575_v55 = vpack.c.bf16 %v541_v31, %v540_v26  ;;  %v576_v56 = vpack.c.bf16 %v543_v44, %v542_v41  ;;  %v577_v57 = vpack.c.bf16 %v545_v43, %v544_v38  ;;  %s2184_s1 = sld [smem:[#allocation18_spill]] }
 0x1af   : > { %1064 = vmatprep.subr.bf16.mxu1 %v1246_v46  ;;  %v1249_v50 = vld [vmem:[%s1948_s9 + $0x18] sm:$0xff]   ;;  %v1250_v51 = vld [vmem:[%s1948_s9 + $0x20] sm:$0xff]   ;;  %v1251_v52 = vld [vmem:[%s1948_s9 + $0x28] sm:$0xff]  }
 0x1b0   : > { %1080 = vmatprep.mubr.bf16.mxu1 %v574_v47  ;;  %1065 = vmatpush3.bf16.msra.mxu1 %v1246_v46  ;;  %v1252_v53 = vld [vmem:[%s1948_s9 + $0x30] sm:$0xff]   ;;  %v1253_v54 = vld [vmem:[%s1948_s9 + $0x38] sm:$0xff]   ;;  %v566_v59 = vld [vmem:[#allocation2] sm:$0xff] }
 0x1b1   : > { %1066 = vmatprep.subr.bf16.mxu1 %v1247_v48  ;;  %v568_v58 = vld [vmem:[#allocation2 + $0x10] sm:$0xff]  ;;  %v569_v61 = vld [vmem:[#allocation2 + $0x18] sm:$0xff]  ;;  %v567_v0 = vld [vmem:[#allocation2 + $0x8] sm:$0xff] }
 0x1b2   : > { %v572_v6 = vld [vmem:[#allocation2 + $0x30] sm:$0xff]  ;;  %v570_v7 = vld [vmem:[#allocation2 + $0x20] sm:$0xff]  ;;  %v573_v9 = vld [vmem:[#allocation2 + $0x38] sm:$0xff] }
 0x1b3   : > { %v571_v12 = vld [vmem:[#allocation2 + $0x28] sm:$0xff] }
 0x1b4   : > { %1067 = vmatpush3.bf16.msra.mxu1 %v1247_v48  ;;  %p1001_p2 = scmp.ne.s32.totalorder %s2184_s1, 3 }
 0x1b5   : > { %1068 = vmatprep.subr.bf16.mxu1 %v1248_v49  ;;  %s2185_s26 = sld [smem:[#allocation32_spill]] (!%p1001_p2) }
 0x1b8   : > { %1069 = vmatpush3.bf16.msra.mxu1 %v1248_v49 }
 0x1b9   : > { %1070 = vmatprep.subr.bf16.mxu1 %v1249_v50 }
 0x1bb   : > { %v1002_v19 = vld [vmem:[%s2185_s26] ss:$0 sm:$0xff] (!%p1001_p2) }
 0x1bc   : > { %1071 = vmatpush3.bf16.msra.mxu1 %v1249_v50 }
 0x1bd   : > { %1072 = vmatprep.subr.bf16.mxu1 %v1250_v51 }
 0x1c0   : > { %1073 = vmatpush3.bf16.msra.mxu1 %v1250_v51 }
 0x1c1   : > { %1074 = vmatprep.subr.bf16.mxu1 %v1251_v52 }
 0x1c4   : > { %1075 = vmatpush3.bf16.msra.mxu1 %v1251_v52 }
 0x1c5   : > { %1076 = vmatprep.subr.bf16.mxu1 %v1252_v53 }
 0x1c8   : > { %1077 = vmatpush3.bf16.msra.mxu1 %v1252_v53 }
 0x1c9   : > { %1078 = vmatprep.subr.bf16.mxu1 %v1253_v54 }
 0x1cc   : > { %1079 = vmatpush3.bf16.msra.mxu1 %v1253_v54 }
 0x1cf   : > { %1081 = vmatmul.mubr.bf16.vlgmr.msra.gmra.mrb[0].mxu1 %v575_v55 }
 0x1d0   : > { %1084 = vmatprep.mubr.bf16.mxu1 %v576_v56 }
 0x1d7   : > { %1085 = vmatmul.mubr.bf16.gmra.mrb[4].mxu1 %v577_v57 }
 0x2a2   : > { %v1082_v60 = vpop.f32.mrb[0].mxu1 }
 0x2a3   : > { %v709_v62 = vadd.f32 %v1082_v60, %v568_v58  ;;  %v676_v63 = vpop.f32.mrb[1].mxu1 }
 0x2a4   : > { %v707_v1 = vadd.f32 %v676_v63, %v566_v59  ;;  %v1083_v2 = vpop.f32.mrb[2].mxu1 }
 0x2a5   : > { %717 = vst [vmem:[#allocation2 + $0x10] sm:$0xff] %v709_v62  ;;  %v710_v3 = vadd.f32 %v1083_v2, %v569_v61  ;;  %v679_v4 = vpop.f32.mrb[3].mxu1 }
 0x2a6   : > { %715 = vst [vmem:[#allocation2] sm:$0xff] %v707_v1  ;;  %v708_v5 = vadd.f32 %v679_v4, %v567_v0 }
 0x2a7   : > { %718 = vst [vmem:[#allocation2 + $0x18] sm:$0xff] %v710_v3 }
 0x2a8   : > { %716 = vst [vmem:[#allocation2 + $0x8] sm:$0xff] %v708_v5 }
 0x2aa   : > { %v1086_v8 = vpop.f32.mrb[4].mxu1  ;;  %726 = sbr.rel (%p1001_p2) target bundleno = 699 (0x2bb), region = 60 }
 0x2ab   : > { %v713_v10 = vadd.f32 %v1086_v8, %v572_v6  ;;  %v692_v11 = vpop.f32.mrb[5].mxu1 }
 0x2ac   : > { %v711_v13 = vadd.f32 %v692_v11, %v570_v7  ;;  %v1087_v14 = vpop.f32.mrb[6].mxu1  ;;  %v729_v23 = vld [vmem:[#allocation2 + $0x10] sm:$0xff] (!%p1001_p2) }
 0x2ad   : > { %721 = vst [vmem:[#allocation2 + $0x30] sm:$0xff] %v713_v10  ;;  %v714_v15 = vadd.f32 %v1087_v14, %v573_v9  ;;  %v695_v16 = vpop.f32.mrb[7].mxu1  ;;  %v727_v18 = vld [vmem:[#allocation2] sm:$0xff] (!%p1001_p2)  ;;  %v744_v26 = vadd.f32 (!%p1001_p2), %v1002_v19, %v729_v23 }
 0x2ae   : > { %719 = vst [vmem:[#allocation2 + $0x20] sm:$0xff] %v711_v13  ;;  %v712_v17 = vadd.f32 %v695_v16, %v571_v12  ;;  %v742_v21 = vadd.f32 (!%p1001_p2), %v1002_v19, %v727_v18  ;;  %v730_v24 = vld [vmem:[#allocation2 + $0x18] sm:$0xff] (!%p1001_p2) }
 0x2af   : > { %722 = vst [vmem:[#allocation2 + $0x38] sm:$0xff] %v714_v15  ;;  %v728_v20 = vld [vmem:[#allocation2 + $0x8] sm:$0xff] (!%p1001_p2)  ;;  %v745_v27 = vadd.f32 (!%p1001_p2), %v1002_v19, %v730_v24  ;;  %752 = vst [vmem:[%s1952_s6 + $0x10] sm:$0xff] (!%p1001_p2), %v744_v26 }
 0x2b0   : > { %720 = vst [vmem:[#allocation2 + $0x28] sm:$0xff] %v712_v17  ;;  %v743_v22 = vadd.f32 (!%p1001_p2), %v1002_v19, %v728_v20  ;;  %750 = vst [vmem:[%s1952_s6] sm:$0xff] (!%p1001_p2), %v742_v21 }
 0x2b1   : > { %753 = vst [vmem:[%s1952_s6 + $0x18] sm:$0xff] %v745_v27 }
 0x2b2   : > { %751 = vst [vmem:[%s1952_s6 + $0x8] sm:$0xff] %v743_v22 }
 0x2b4   : > { %v733_v30 = vld [vmem:[#allocation2 + $0x30] sm:$0xff] }
 0x2b5   : > { %v731_v25 = vld [vmem:[#allocation2 + $0x20] sm:$0xff]  ;;  %v748_v33 = vadd.f32 %v1002_v19, %v733_v30 }
 0x2b6   : > { %v746_v28 = vadd.f32 %v1002_v19, %v731_v25  ;;  %v734_v31 = vld [vmem:[#allocation2 + $0x38] sm:$0xff] }
 0x2b7   : > { %v732_v29 = vld [vmem:[#allocation2 + $0x28] sm:$0xff]  ;;  %v749_v34 = vadd.f32 %v1002_v19, %v734_v31  ;;  %756 = vst [vmem:[%s1952_s6 + $0x30] sm:$0xff] %v748_v33 }
 0x2b8   : > { %v747_v32 = vadd.f32 %v1002_v19, %v732_v29  ;;  %754 = vst [vmem:[%s1952_s6 + $0x20] sm:$0xff] %v746_v28 }
 0x2b9   : > { %757 = vst [vmem:[%s1952_s6 + $0x38] sm:$0xff] %v749_v34 }
 0x2ba   : > { %755 = vst [vmem:[%s1952_s6 + $0x28] sm:$0xff] %v747_v32 }
 0x2bb PF: > { %s2186_s19 = sld [smem:[#allocation19_spill]]  ;;  %s2187_s12 = sld [smem:[#allocation33_spill]] }
 0x2bc   : > { %s777_s16 = sshll.u32 %s1952_s6, 4  ;;  %s759_s4 = scalar_lea.sflag [#allocation5], %s1892_s17  ;;  %s1984_s16 = int_to_ptr.vmem [resolvable:$true] %s777_s16 }
 0x2bd   : > { %s1344_s7 = scalar_lea.vmem %s1984_s16, 1024  ;;  %p2188_p11 = scmp.ne.s32.totalorder %s2164_s30, 0 }
 0x2be   : > { %p1345_p12 = scmp.ne.s32.totalorder %s1984_s16, %s1344_s7  ;;  %s1537_s29 = smov [#allocation9]  }
 0x2bf   : > { %s1348_s9 = sshll.u32 %s1537_s29, 4  ;;  %s1349_s9 = int_to_ptr.vmem [resolvable:$false] %s1348_s9 }
 0x2c0   : > { %p1346_p8 = pnand %p1345_p12, %p2188_p11  ;;  %s1350_s1 = scalar_lea.vmem %s1349_s9, 2048 }
 0x2c1   : > { %s1014_s0 = sshll.u32 %s2186_s19, 10  ;;  %p1351_p1 = scmp.lt.s32.totalorder %s1984_s16, %s1349_s9 }
 0x2c2   : > { %s1981_s24 = scalar_lea.hbm %s2187_s12, %s1014_s0  ;;  %p1347_p4 = pneg %p1346_p8 }
 0x2c3   : > { %p1352_p10 = scmp.lt.s32.totalorder %s1350_s1, %s1344_s7 }
 0x2c5   : > { %p1353_p7 = por %p1352_p10, %p1351_p1 }
 0x2c7   : > { %p1354_p9 = pnand %p1353_p7, %p1347_p4 }
 0x2c9   : > { %1357 = shalt.err (!%p1354_p9)
}
 0x2ca   : > { %s1358_s6 = scalar_lea.hbm %s1981_s24, 1024  ;;  %s1362_s26 = scalar_lea.hbm %s2187_s12, 2048 }
 0x2cb   : > { %p1359_p3 = scmp.ne.s32.totalorder %s1981_s24, %s1358_s6  ;;  %p1363_p13 = scmp.lt.u32.totalorder %s1981_s24, %s2187_s12 }
 0x2cc   : > { %p1364_p0 = scmp.lt.u32.totalorder %s1362_s26, %s1358_s6  ;;  %p1366_p12 = scmp.lt.u32.totalorder %s1358_s6, %s1981_s24 }
 0x2cd   : > { %p1360_p5 = pnand %p1359_p3, %p2188_p11 }
 0x2ce   : > { %p1365_p2 = por %p1364_p0, %p1363_p13 }
 0x2cf   : > { %p1361_p6 = pneg %p1360_p5 }
 0x2d0   : > { %p1367_p8 = por %p1366_p12, %p1365_p2 }
 0x2d2   : > { %p1368_p4 = pnand %p1367_p8, %p1361_p6 }
 0x2d4   : > { %1371 = shalt.err (!%p1368_p4)
}
 0x2d5   : > { %s1538_s13 = smov 128   ;;  %s2189_s7 = sld [smem:[#allocation18_spill]] }
 0x2d6   : > { %s1539_s29 = smov 8   ;;  %s1015_s9 = sshll.u32 %s2186_s19, 5 }
 0x2d7   : > { %1094 = dma.vmem_to_hbm [thread:$0]  (%p2188_p11), %s1984_s16, 1024, %s1981_s24, %s759_s4, %s1538_s13, %s1538_s13, %s1539_s29  }
 0x2d8   : > { %s795_s1 = sshll.u32 %s1934_s2, 4  ;;  %s2190_s0 = sld [smem:[#allocation34_spill]]  ;;  %s2016_s1 = int_to_ptr.vmem [resolvable:$true] %s795_s1 }
 0x2d9   : > { %s2025_s30 = scalar_lea.sflag [#allocation11], %s379_s11  ;;  %s1372_s3 = scalar_lea.vmem %s2016_s1, 1024 }
 0x2da   : > { %p1373_p1 = scmp.ne.s32.totalorder %s2016_s1, %s1372_s3  ;;  %p2191_p11 = scmp.ne.s32.totalorder %s2168_s20, 0 }
 0x2db   : > { %s792_s6 = sadd.s32 %s2189_s7, %s1015_s9  ;;  %s1540_s17 = smov [#allocation10]  }
 0x2dc   : > { %s1009_s15 = sshll.u32 %s792_s6, 7  ;;  %p1374_p10 = pnand %p1373_p1, %p2191_p11 }
 0x2dd   : > { %s1376_s2 = sshll.u32 %s1540_s17, 4  ;;  %s1377_s2 = int_to_ptr.vmem [resolvable:$false] %s1376_s2 }
 0x2de   : > { %s2021_s5 = scalar_lea.hbm %s2190_s0, %s1009_s15  ;;  %p1375_p7 = pneg %p1374_p10 }
 0x2df   : > { %s1378_s19 = scalar_lea.vmem %s1377_s2, 2048  ;;  %p1379_p9 = scmp.lt.s32.totalorder %s2016_s1, %s1377_s2 }
 0x2e0   : > { %p1380_p3 = scmp.lt.s32.totalorder %s1378_s19, %s1372_s3 }
 0x2e2   : > { %p1381_p5 = por %p1380_p3, %p1379_p9 }
 0x2e4   : > { %p1382_p6 = pnand %p1381_p5, %p1375_p7 }
 0x2e6   : > { %1385 = shalt.err (!%p1382_p6)
}
 0x2e7   : > { %s1386_s11 = scalar_lea.hbm %s2021_s5, 1024  ;;  %s1390_s4 = scalar_lea.hbm %s2190_s0, 8192 }
 0x2e8   : > { %p1387_p13 = scmp.ne.s32.totalorder %s2021_s5, %s1386_s11  ;;  %p1391_p12 = scmp.lt.u32.totalorder %s2021_s5, %s2190_s0 }
 0x2e9   : > { %p1392_p8 = scmp.lt.u32.totalorder %s1390_s4, %s1386_s11  ;;  %p1394_p1 = scmp.lt.u32.totalorder %s1386_s11, %s2021_s5 }
 0x2ea   : > { %p1388_p0 = pnand %p1387_p13, %p2191_p11 }
 0x2eb   : > { %p1393_p4 = por %p1392_p8, %p1391_p12 }
 0x2ec   : > { %p1389_p2 = pneg %p1388_p0 }
 0x2ed   : > { %p1395_p10 = por %p1394_p1, %p1393_p4 }
 0x2ef   : > { %p1396_p7 = pnand %p1395_p10, %p1389_p2 }
 0x2f1   : > { %1399 = shalt.err (!%p1396_p7)
}
 0x2f2   : > { %s1541_s3 = smov 512  }
 0x2f3   : > { %1095 = dma.vmem_to_hbm [thread:$0]  (%p2191_p11), %s2016_s1, 1024, %s2021_s5, %s2025_s30, %s1538_s13, %s1541_s3, %s1539_s29  }
 0x2f4 PF: > { %s2192_s6 = sld [smem:[#allocation26_spill]]  ;;  %p1116_p9 = scmp.ge.s32.totalorder %s1526_s10, 2 }
 0x2f5   : > { %s810_s15 = sand.u32 1, %s1498_s27  }
 0x2f6   : > { %s811_s14 = scalar_lea.sflag [#allocation5], %s810_s15 }
 0x2fa   : > { %p2193_p3 = scmp.ne.s32.totalorder %s2192_s6, 0 }
 0x2fc   : > { %p1109_p5 = pnand %p1116_p9, %p2193_p3 }
 0x2fe   : > { %1465 = dma.done.wait (!%p1109_p5), %s811_s14, 1024  }
 0x2ff   : > { %1467 = vsyncadd (!%p1109_p5), %s811_s14, 4294966272  ;;  %s819_s20 = sand.u32 1, %s1474_s21   ;;  %p2194_p6 = scmp.ne.s32.totalorder %s2169_s18, 0 }
 0x300   : > { %s820_s26 = scalar_lea.sflag [#allocation11], %s819_s20 }
 0x301   : > { %p1112_p13 = pnand %p1116_p9, %p2194_p6 }
 0x303   : > { %1469 = dma.done.wait (!%p1112_p13), %s820_s26, 1024  }
 0x304   : > { %1471 = vsyncadd (!%p1112_p13), %s820_s26, 4294966272  ;;  %s29_s10 = sadd.s32 1, %s1526_s10   ;;  %s2196_s27 = sld [smem:[#allocation27_spill]] }
 0x305   : > { %p2059_p11 = scmp.ge.s32.totalorder %s29_s10, 10   ;;  %s2197_s29 = sld [smem:[#allocation16_spill]] }
 0x306   : > { %s2198_s26 = sld [smem:[#allocation24_spill]]  ;;  %s2199_s1 = sld [smem:[#allocation17_spill]] }
 0x307   : > { %s2200_s5 = sld [smem:[#allocation25_spill]]  ;;  %s2201_s7 = sld [smem:[#allocation20_spill]] }
 0x308   : > { %s2202_s18 = sld [smem:[#allocation21_spill]]  ;;  %s2203_s9 = sld [smem:[#allocation22_spill]] }
 0x309   : > { %s2204_s21 = smov %s1478_s22  ;;  %s2205_s22 = smov %s1482_s23 }
 0x30a   : > { %s2206_s23 = smov %s2196_s27  ;;  %s2207_s24 = smov %s1490_s25 }
 0x30b   : > { %s2208_s25 = smov %s2197_s29  ;;  %s2209_s27 = smov %s1502_s28 }
 0x30c   : > { %s2210_s28 = smov %s2199_s1  ;;  %s2212_s30 = smov %s1518_s8 }
 0x30d   : > { %s2211_s29 = smov %s2200_s5  ;;  %28 = sbr.rel (!%p2059_p11) target bundleno = 22 (0x16), region = 137 }
 0x30e   : > { %s2213_s8 = smov %s2202_s18 }
 0x314   :  { %825 = vsyncpa [#allocation4], 1 }
 0x315   :  { %827 = vsyncpa [#allocation4 + $0x1], 1 }
 0x316   :  { %828 = vsyncpa [#allocation7], 1 }
 0x317   :  { %830 = vsyncpa [#allocation7 + $0x1], 1 }
 0x318   :  { %831 = vsyncpa [#allocation5], 1 }
 0x319   :  { %833 = vsyncpa [#allocation5 + $0x1], 1 }
 0x31a   :  { %834 = vsyncpa [#allocation11], 1 }
 0x31b   :  { %836 = vsyncpa [#allocation11 + $0x1], 1 }

</bundles_post_ra>
